<compile_context>
chip_gen: v7x
topology: tpu7x:2x2x1
jax: 0.10.0
libtpu: 0.0.40
codegen_flags: <defaults>
</compile_context>

<pallas_src>
import functools
import math

import jax
import jax.numpy as jnp
from jax.experimental import pallas as pl
from jax.experimental.pallas import tpu as pltpu


_MiB = 1 << 20
_VMEM_BUDGET = 40 * _MiB          # conservative: fits v7x (64 MiB phys), v5e/v6e


def _round_up(x: int, m: int) -> int:
    return (x + m - 1) // m * m


def _padded_hidden(H: int) -> int:
    if H <= 128:
        return 128
    # Align K/N to 256 so they fill the 2x256^2 MXU on v6e/v7x (harmless on v5e).
    return _round_up(H, 256)


def _vmem_bytes(tm: int, hp: int) -> int:
    weights = 2 * hp * hp * 2            # W1^T + W2^T, bf16, single-buffered
    biases = 2 * 2 * hp * 4              # b1/b2, f32 (tiny)
    acts = 2 * tm * hp * 2 * 2           # x-in + out tiles, bf16, double-buffered
    temps = 2 * tm * hp * 4              # h (f32) + headroom for other temporaries
    return weights + biases + acts + temps


def _choose_row_tile(M: int, Hp: int, row_tile: int) -> int:
    tm = min(row_tile, _round_up(M, 8))
    # Keep the parallel grid >= 2 steps when M allows (v7x megacore sharding).
    tm = min(tm, max(8, _round_up(pl.cdiv(M, 2), 8)))
    while tm > 8 and _vmem_bytes(tm, Hp) > _VMEM_BUDGET:
        tm = max(8, _round_up(tm // 2, 8))
    return tm


# ------------------------------- Pallas kernel --------------------------------

def _ffn_kernel(x_ref, w1_ref, b1_ref, w2_ref, b2_ref, o_ref, *, if_gelu):
    """One (TM, Hp) row-tile of:  y = W2(act(W1 x + b1)) + b2 + x."""
    x = x_ref[...]                                             # (TM, Hp) bf16
    # First linear: bf16 operands, f32 accumulation on the MXU.
    h = jnp.dot(x, w1_ref[...], preferred_element_type=jnp.float32) + b1_ref[...]
    if if_gelu:
        h = jax.nn.gelu(h, approximate=False)                  # torch.nn.GELU()
    else:
        h = jnp.maximum(h, 0.0)                                # torch.nn.ReLU()
    # dropout1 / dropout2 are identity in eval mode.
    y = jnp.dot(h.astype(jnp.bfloat16), w2_ref[...],
                preferred_element_type=jnp.float32) + b2_ref[...]
    o_ref[...] = (x.astype(jnp.float32) + y).astype(o_ref.dtype)   # residual


def _build_call(TM, Hp, M, if_gelu, out_dtype, vmem_limit, single_buffer_weights):
    wkw = {"pipeline_mode": pl.Buffered(1)} if single_buffer_weights else {}
    in_specs = [
        pl.BlockSpec((TM, Hp), lambda i: (i, 0)),               # activation row-tile
        pl.BlockSpec((Hp, Hp), lambda i: (0, 0), **wkw),         # W1^T (replicated)
        pl.BlockSpec((1, Hp), lambda i: (0, 0), **wkw),          # b1
        pl.BlockSpec((Hp, Hp), lambda i: (0, 0), **wkw),         # W2^T (replicated)
        pl.BlockSpec((1, Hp), lambda i: (0, 0), **wkw),          # b2
    ]
    return pl.pallas_call(
        functools.partial(_ffn_kernel, if_gelu=if_gelu),
        out_shape=jax.ShapeDtypeStruct((M, Hp), out_dtype),
        grid=(pl.cdiv(M, TM),),
        in_specs=in_specs,
        out_specs=pl.BlockSpec((TM, Hp), lambda i: (i, 0)),
        compiler_params=pltpu.CompilerParams(
            dimension_semantics=("parallel",),
            vmem_limit_bytes=vmem_limit),
    )


# ------------------------------ weight packing ---------------------------------

def pack_ffn_params(w1, b1, w2, b2):
    """Pack PyTorch-layout Linear params (out,in)/(out,) ONCE per module.

    For the Conv1d(kernel_size=1) branch pass w[:, :, 0].
    NOTE: x columns and weight rows/cols are zero-padded together, so padded
    lanes contribute exactly 0 to every dot product.
    """
    H = int(w1.shape[0])
    Hp = _padded_hidden(H)
    ph = Hp - H
    w1t = jnp.pad(jnp.asarray(w1, jnp.float32).T, ((0, ph), (0, ph))).astype(jnp.bfloat16)
    w2t = jnp.pad(jnp.asarray(w2, jnp.float32).T, ((0, ph), (0, ph))).astype(jnp.bfloat16)
    b1p = jnp.pad(jnp.asarray(b1, jnp.float32).reshape(1, H), ((0, 0), (0, ph)))
    b2p = jnp.pad(jnp.asarray(b2, jnp.float32).reshape(1, H), ((0, 0), (0, ph)))
    return {"hidden": H, "hidden_padded": Hp,
            "w1t": w1t, "b1": b1p, "w2t": w2t, "b2": b2p}


# --------------------------------- forward -------------------------------------

def point_wise_feed_forward_packed(x, params, *, if_gelu=False, row_tile=512,
                                   out_dtype=jnp.bfloat16):
    """x: (..., H). params: output of pack_ffn_params. Returns (..., H)."""
    orig_shape = x.shape
    H = orig_shape[-1]
    assert H == params["hidden"], "params were packed for a different hidden size"
    Hp = params["hidden_padded"]
    M = 1
    for d in orig_shape[:-1]:
        M *= d

    # TODO(synk): for Hp >= ~2048 the whole (Hp,Hp) bf16 weights no longer fit
    # in VMEM (notably v7x's 64 MiB); that regime needs an N/K-tiled grid with
    # an f32 accumulator instead of full weight replication.
    TM = _choose_row_tile(M, Hp, row_tile)
    vmem_limit = int(min(64 * _MiB, max(32 * _MiB, _vmem_bytes(TM, Hp) * 5 // 4)))

    # bf16 activation I/O; skip the pad when H is already lane-aligned.
    x2 = x.reshape(M, H)
    if x2.dtype != jnp.bfloat16:
        x2 = x2.astype(jnp.bfloat16)
    if Hp != H:
        x2 = jnp.pad(x2, ((0, 0), (0, Hp - H)))

    args = (x2, params["w1t"], params["b1"], params["w2t"], params["b2"])
    try:
        out = _build_call(TM, Hp, M, if_gelu, out_dtype, vmem_limit, True)(*args)
    except Exception:
        # Fallback for environments without BlockSpec(pipeline_mode=...) support.
        out = _build_call(TM, Hp, M, if_gelu, out_dtype, vmem_limit, False)(*args)

    if Hp != H:
        out = out[:, :H]
    return out.reshape(orig_shape)


def point_wise_feed_forward(x, w1, b1, w2, b2, *, if_gelu=False, row_tile=512,
                            out_dtype=jnp.bfloat16):
    """Convenience one-shot wrapper (packs weights per call; prefer the packed API)."""
    return point_wise_feed_forward_packed(
        x, pack_ffn_params(w1, b1, w2, b2),
        if_gelu=if_gelu, row_tile=row_tile, out_dtype=out_dtype)


# -------------------------------- reference ------------------------------------

def ref_forward(x, w1, b1, w2, b2, *, if_gelu=False):
    """Pure-JAX f32 mirror of PointWiseFeedForward.forward in eval() mode."""
    h = x @ w1.T + b1
    h = jax.nn.gelu(h, approximate=False) if if_gelu else jnp.maximum(h, 0.0)
    return (h @ w2.T + b2) + x


# ----------------------------------- main ---------------------------------------

if __name__ == "__main__":
    B, L, H = 2, 8, 32          # (batch, seq, hidden_units)

    key = jax.random.PRNGKey(0)
    kx, k1, k2, k3, k4 = jax.random.split(key, 5)
    bound = 1.0 / math.sqrt(H)
    x = jax.random.normal(kx, (B, L, H), dtype=jnp.float32)
    w1 = jax.random.uniform(k1, (H, H), jnp.float32, -bound, bound)
    b1 = jax.random.uniform(k2, (H,), jnp.float32, -bound, bound)
    w2 = jax.random.uniform(k3, (H, H), jnp.float32, -bound, bound)
    b2 = jax.random.uniform(k4, (H,), jnp.float32, -bound, bound)

    packed = pack_ffn_params(w1, b1, w2, b2)   # hoisted out of the forward path

    for if_gelu in (False, True):   # exercise both ReLU and GELU branches
        out = point_wise_feed_forward_packed(x, packed, if_gelu=if_gelu)
        out = jax.block_until_ready(out)
        ref = ref_forward(x, w1, b1, w2, b2, if_gelu=if_gelu)
        assert out.shape == (B, L, H)
        out_f32 = out.astype(jnp.float32)
        err = jnp.max(jnp.abs(out_f32 - ref))
        # bf16 activation I/O + bf16 MXU operands -> documented precision
        # trade-off vs. the pure-f32 torch reference.
        assert jnp.allclose(out_f32, ref, atol=6e-2, rtol=6e-2), \
            f"if_gelu={if_gelu}: max abs err {err}"

    print("KERNEL_OK")
</pallas_src>

<mosaic_0001>
module attributes {stable_mosaic.version = 11 : i64} {
  func.func @_ffn_kernel(%arg0: i32, %arg1: memref<8x128xbf16, #tpu.memory_space<vmem>>, %arg2: memref<128x128xbf16, #tpu.memory_space<vmem>>, %arg3: memref<1x128xf32, #tpu.memory_space<vmem>>, %arg4: memref<128x128xbf16, #tpu.memory_space<vmem>>, %arg5: memref<1x128xf32, #tpu.memory_space<vmem>>, %arg6: memref<8x128xbf16, #tpu.memory_space<vmem>>) attributes {dimension_semantics = [#tpu.dimension_semantics<parallel>], iteration_bounds = array<i64: 2>, scalar_prefetch = 0 : i64, scratch_operands = 0 : i64, tpu.core_type = #tpu.core_type<tc>, window_params = [{transform_indices = @transform_0, window_bounds = array<i64: 8, 128>}, {pipeline_mode = #tpu.pipeline_mode<synchronous>, transform_indices = @transform_1, window_bounds = array<i64: 128, 128>}, {pipeline_mode = #tpu.pipeline_mode<synchronous>, transform_indices = @transform_2, window_bounds = array<i64: 1, 128>}, {pipeline_mode = #tpu.pipeline_mode<synchronous>, transform_indices = @transform_3, window_bounds = array<i64: 128, 128>}, {pipeline_mode = #tpu.pipeline_mode<synchronous>, transform_indices = @transform_4, window_bounds = array<i64: 1, 128>}, {transform_indices = @transform_5, window_bounds = array<i64: 8, 128>}]} {
    %c0 = arith.constant 0 : index
    %c0_0 = arith.constant 0 : index
    %0 = vector.load %arg1[%c0, %c0_0] : memref<8x128xbf16, #tpu.memory_space<vmem>>, vector<8x128xbf16>
    %c0_1 = arith.constant 0 : index
    %c0_2 = arith.constant 0 : index
    %1 = vector.load %arg2[%c0_1, %c0_2] : memref<128x128xbf16, #tpu.memory_space<vmem>>, vector<128x128xbf16>
    %cst = arith.constant dense<0.000000e+00> : vector<8x128xf32>
    %2 = tpu.matmul %0, %1, %cst {dimension_numbers = #tpu.dot_dimension_numbers<[1], [0], [0], [1], [0, 0, 1, 1], [], []>} : vector<8x128xbf16>, vector<128x128xbf16>, vector<8x128xf32> -> vector<8x128xf32>
    %c0_3 = arith.constant 0 : index
    %c0_4 = arith.constant 0 : index
    %3 = vector.load %arg3[%c0_3, %c0_4] : memref<1x128xf32, #tpu.memory_space<vmem>>, vector<1x128xf32>
    %4 = vector.broadcast %3 : vector<1x128xf32> to vector<8x128xf32>
    %5 = arith.addf %2, %4 : vector<8x128xf32>
    %cst_5 = arith.constant 0.000000e+00 : f32
    %6 = vector.broadcast %cst_5 : f32 to vector<8x128xf32>
    %7 = arith.maximumf %5, %6 : vector<8x128xf32>
    %8 = arith.truncf %7 : vector<8x128xf32> to vector<8x128xbf16>
    %c0_6 = arith.constant 0 : index
    %c0_7 = arith.constant 0 : index
    %9 = vector.load %arg4[%c0_6, %c0_7] : memref<128x128xbf16, #tpu.memory_space<vmem>>, vector<128x128xbf16>
    %cst_8 = arith.constant dense<0.000000e+00> : vector<8x128xf32>
    %10 = tpu.matmul %8, %9, %cst_8 {dimension_numbers = #tpu.dot_dimension_numbers<[1], [0], [0], [1], [0, 0, 1, 1], [], []>} : vector<8x128xbf16>, vector<128x128xbf16>, vector<8x128xf32> -> vector<8x128xf32>
    %c0_9 = arith.constant 0 : index
    %c0_10 = arith.constant 0 : index
    %11 = vector.load %arg5[%c0_9, %c0_10] : memref<1x128xf32, #tpu.memory_space<vmem>>, vector<1x128xf32>
    %12 = vector.broadcast %11 : vector<1x128xf32> to vector<8x128xf32>
    %13 = arith.addf %10, %12 : vector<8x128xf32>
    %14 = arith.extf %0 : vector<8x128xbf16> to vector<8x128xf32>
    %15 = arith.addf %14, %13 : vector<8x128xf32>
    %16 = arith.truncf %15 : vector<8x128xf32> to vector<8x128xbf16>
    %c0_11 = arith.constant 0 : index
    %c0_12 = arith.constant 0 : index
    %17 = vector.load %arg6[%c0_11, %c0_12] : memref<8x128xbf16, #tpu.memory_space<vmem>>, vector<8x128xbf16>
    tpu.vector_store %arg6[%c0_11, %c0_12], %16 {strides = array<i32>} : memref<8x128xbf16, #tpu.memory_space<vmem>>, vector<8x128xbf16>,
    return
  }
  func.func @transform_0(%arg0: i32) -> (i32, i32) {
    %c0_i32 = arith.constant 0 : i32
    %c0_i32_0 = arith.constant 0 : i32
    return %arg0, %c0_i32 : i32, i32
  }
  func.func @transform_1(%arg0: i32) -> (i32, i32) {
    %c0_i32 = arith.constant 0 : i32
    %c0_i32_0 = arith.constant 0 : i32
    %c0_i32_1 = arith.constant 0 : i32
    return %c0_i32, %c0_i32_0 : i32, i32
  }
  func.func @transform_2(%arg0: i32) -> (i32, i32) {
    %c0_i32 = arith.constant 0 : i32
    %c0_i32_0 = arith.constant 0 : i32
    %c0_i32_1 = arith.constant 0 : i32
    return %c0_i32, %c0_i32_0 : i32, i32
  }
  func.func @transform_3(%arg0: i32) -> (i32, i32) {
    %c0_i32 = arith.constant 0 : i32
    %c0_i32_0 = arith.constant 0 : i32
    %c0_i32_1 = arith.constant 0 : i32
    return %c0_i32, %c0_i32_0 : i32, i32
  }
  func.func @transform_4(%arg0: i32) -> (i32, i32) {
    %c0_i32 = arith.constant 0 : i32
    %c0_i32_0 = arith.constant 0 : i32
    %c0_i32_1 = arith.constant 0 : i32
    return %c0_i32, %c0_i32_0 : i32, i32
  }
  func.func @transform_5(%arg0: i32) -> (i32, i32) {
    %c0_i32 = arith.constant 0 : i32
    %c0_i32_0 = arith.constant 0 : i32
    return %arg0, %c0_i32 : i32, i32
  }
}

module attributes {stable_mosaic.version = 11 : i64} {
  func.func @_ffn_kernel(%arg0: i32, %arg1: memref<8x128xbf16, #tpu.memory_space<vmem>>, %arg2: memref<128x128xbf16, #tpu.memory_space<vmem>>, %arg3: memref<1x128xf32, #tpu.memory_space<vmem>>, %arg4: memref<128x128xbf16, #tpu.memory_space<vmem>>, %arg5: memref<1x128xf32, #tpu.memory_space<vmem>>, %arg6: memref<8x128xbf16, #tpu.memory_space<vmem>>) attributes {dimension_semantics = [#tpu.dimension_semantics<parallel>], iteration_bounds = array<i64: 2>, scalar_prefetch = 0 : i64, scratch_operands = 0 : i64, tpu.core_type = #tpu.core_type<tc>, window_params = [{transform_indices = @transform_0, window_bounds = array<i64: 8, 128>}, {pipeline_mode = #tpu.pipeline_mode<synchronous>, transform_indices = @transform_1, window_bounds = array<i64: 128, 128>}, {pipeline_mode = #tpu.pipeline_mode<synchronous>, transform_indices = @transform_2, window_bounds = array<i64: 1, 128>}, {pipeline_mode = #tpu.pipeline_mode<synchronous>, transform_indices = @transform_3, window_bounds = array<i64: 128, 128>}, {pipeline_mode = #tpu.pipeline_mode<synchronous>, transform_indices = @transform_4, window_bounds = array<i64: 1, 128>}, {transform_indices = @transform_5, window_bounds = array<i64: 8, 128>}]} {
    %c0 = arith.constant 0 : index
    %c0_0 = arith.constant 0 : index
    %0 = vector.load %arg1[%c0, %c0_0] : memref<8x128xbf16, #tpu.memory_space<vmem>>, vector<8x128xbf16>
    %c0_1 = arith.constant 0 : index
    %c0_2 = arith.constant 0 : index
    %1 = vector.load %arg2[%c0_1, %c0_2] : memref<128x128xbf16, #tpu.memory_space<vmem>>, vector<128x128xbf16>
    %cst = arith.constant dense<0.000000e+00> : vector<8x128xf32>
    %2 = tpu.matmul %0, %1, %cst {dimension_numbers = #tpu.dot_dimension_numbers<[1], [0], [0], [1], [0, 0, 1, 1], [], []>} : vector<8x128xbf16>, vector<128x128xbf16>, vector<8x128xf32> -> vector<8x128xf32>
    %c0_3 = arith.constant 0 : index
    %c0_4 = arith.constant 0 : index
    %3 = vector.load %arg3[%c0_3, %c0_4] : memref<1x128xf32, #tpu.memory_space<vmem>>, vector<1x128xf32>
    %4 = vector.broadcast %3 : vector<1x128xf32> to vector<8x128xf32>
    %5 = arith.addf %2, %4 : vector<8x128xf32>
    %cst_5 = arith.constant 0.000000e+00 : f32
    %6 = vector.broadcast %cst_5 : f32 to vector<8x128xf32>
    %7 = arith.maximumf %5, %6 : vector<8x128xf32>
    %8 = arith.truncf %7 : vector<8x128xf32> to vector<8x128xbf16>
    %c0_6 = arith.constant 0 : index
    %c0_7 = arith.constant 0 : index
    %9 = vector.load %arg4[%c0_6, %c0_7] : memref<128x128xbf16, #tpu.memory_space<vmem>>, vector<128x128xbf16>
    %cst_8 = arith.constant dense<0.000000e+00> : vector<8x128xf32>
    %10 = tpu.matmul %8, %9, %cst_8 {dimension_numbers = #tpu.dot_dimension_numbers<[1], [0], [0], [1], [0, 0, 1, 1], [], []>} : vector<8x128xbf16>, vector<128x128xbf16>, vector<8x128xf32> -> vector<8x128xf32>
    %c0_9 = arith.constant 0 : index
    %c0_10 = arith.constant 0 : index
    %11 = vector.load %arg5[%c0_9, %c0_10] : memref<1x128xf32, #tpu.memory_space<vmem>>, vector<1x128xf32>
    %12 = vector.broadcast %11 : vector<1x128xf32> to vector<8x128xf32>
    %13 = arith.addf %10, %12 : vector<8x128xf32>
    %14 = arith.extf %0 : vector<8x128xbf16> to vector<8x128xf32>
    %15 = arith.addf %14, %13 : vector<8x128xf32>
    %16 = arith.truncf %15 : vector<8x128xf32> to vector<8x128xbf16>
    %c0_11 = arith.constant 0 : index
    %c0_12 = arith.constant 0 : index
    %17 = vector.load %arg6[%c0_11, %c0_12] : memref<8x128xbf16, #tpu.memory_space<vmem>>, vector<8x128xbf16>
    tpu.vector_store %arg6[%c0_11, %c0_12], %16 {strides = array<i32>} : memref<8x128xbf16, #tpu.memory_space<vmem>>, vector<8x128xbf16>,
    return
  }
  func.func @transform_0(%arg0: i32) -> (i32, i32) {
    %c0_i32 = arith.constant 0 : i32
    %c0_i32_0 = arith.constant 0 : i32
    return %arg0, %c0_i32 : i32, i32
  }
  func.func @transform_1(%arg0: i32) -> (i32, i32) {
    %c0_i32 = arith.constant 0 : i32
    %c0_i32_0 = arith.constant 0 : i32
    %c0_i32_1 = arith.constant 0 : i32
    return %c0_i32, %c0_i32_0 : i32, i32
  }
  func.func @transform_2(%arg0: i32) -> (i32, i32) {
    %c0_i32 = arith.constant 0 : i32
    %c0_i32_0 = arith.constant 0 : i32
    %c0_i32_1 = arith.constant 0 : i32
    return %c0_i32, %c0_i32_0 : i32, i32
  }
  func.func @transform_3(%arg0: i32) -> (i32, i32) {
    %c0_i32 = arith.constant 0 : i32
    %c0_i32_0 = arith.constant 0 : i32
    %c0_i32_1 = arith.constant 0 : i32
    return %c0_i32, %c0_i32_0 : i32, i32
  }
  func.func @transform_4(%arg0: i32) -> (i32, i32) {
    %c0_i32 = arith.constant 0 : i32
    %c0_i32_0 = arith.constant 0 : i32
    %c0_i32_1 = arith.constant 0 : i32
    return %c0_i32, %c0_i32_0 : i32, i32
  }
  func.func @transform_5(%arg0: i32) -> (i32, i32) {
    %c0_i32 = arith.constant 0 : i32
    %c0_i32_0 = arith.constant 0 : i32
    return %arg0, %c0_i32 : i32, i32
  }
}

</mosaic_0001>

<bundles_post_ra>
// kernel: tpu_custom_call.1
= control target key start
LH: loop header
LB: loop body
LE: loop exit
PB: predicated region body
PF: predicated region fallthrough
CT: control target
= control target key end

     0   :  { %10 = vsyncpa [#allocation3], 0  ;;  %s1219_s0 = inlined_call_operand.hbm [shape: bf16[16,128], index: 0, kind: input, shape index: {}]   ;;  %s1220_s1 = inlined_call_operand.hbm [shape: bf16[128,128], index: 1, kind: input, shape index: {}]   ;;  %s1221_s2 = inlined_call_operand.vmem [shape: f32[1,128], index: 2, kind: input, shape index: {}]   ;;  %s1222_s3 = inlined_call_operand.hbm [shape: bf16[128,128], index: 3, kind: input, shape index: {}]   ;;  %s1223_s4 = inlined_call_operand.vmem [shape: f32[1,128], index: 4, kind: input, shape index: {}]   ;;  %s1224_s5 = inlined_call_operand.hbm [shape: bf16[16,128], index: 5, kind: output, shape index: {}]  }
   0x1   :  { %12 = vsyncpa [#allocation3 + $0x1], 0 }
   0x2   :  { %13 = vsyncpa [#allocation6], 0 }
   0x3   :  { %14 = vsyncpa [#allocation4], 0 }
   0x4   :  { %16 = vsyncpa [#allocation4 + $0x1], 0  ;;  %s977_s18 = smov 0   ;;  %s979_s19 = smov 0  }
   0x5   :  { %s981_s20 = smov 0   ;;  %s983_s21 = smov 0  }
   0x6 LB: > { %s998_s22 = sadd.s32 4294967295, %s937_s21   ;;  %s602_s23 = sadd.s32 4294967294, %s937_s21   ;;  %s937_s21 = sphi %s983_s21, %s1244_s21   ;;  %s933_s20 = sphi %s981_s20, %s1243_s20   ;;  %s929_s19 = sphi %s979_s19, %s1242_s19   ;;  %s925_s18 = sphi %s977_s18, %s1241_s18  }
   0x7   : > { %p42_p0 = scmp.ne.s32.totalorder %s929_s19, %s925_s18  ;;  %p1225_p1 = scmp.eq.s32.totalorder %s998_s22, 0 }
   0x8   : > { %p156_p3 = scmp.eq.s32.totalorder %s602_s23, 1  ;;  %p603_p5 = scmp.ge.s32.totalorder %s937_s21, 1 }
   0x9   : > { %p1007_p4 = por %p1225_p1, %p42_p0  ;;  %p163_p7 = scmp.lt.s32.totalorder %s937_s21, 3 }
   0xa   : > { %p1012_p6 = por %p156_p3, %p42_p0  ;;  %s939_s27 = smov [#allocation5]  }
   0xb   : > { %s1228_s24 = scalar_select %p1007_p4, 1, 0 }
   0xc   : > { %s1229_s25 = scalar_select %p1012_p6, 1, 0 }
   0xd   : > { %p1017_p8 = pnand %p603_p5, %p163_p7  ;;  %s175_s28 = sshll.u32 %s939_s27, 4  ;;  %s1021_s28 = int_to_ptr.vmem [resolvable:$true] %s175_s28 }
   0xe   : > { %s940_s30 = smov [#allocation7]   ;;  %s781_s9 = scalar_lea.hbm %s1220_s1, 1024 }
   0xf   : > { %p706_p9 = pneg %p1017_p8  ;;  %s191_s6 = sshll.u32 %s940_s30, 4  ;;  %s1032_s6 = int_to_ptr.vmem [resolvable:$true] %s191_s6 }
  0x10   : > { %p782_p12 = scmp.ne.s32.totalorder %s1220_s1, %s781_s9  ;;  %p788_p5 = scmp.lt.u32.totalorder %s781_s9, %s1220_s1 }
  0x11   : > { %p1028_p11 = pnand %p706_p9, %p1225_p1 }
  0x13   : > { %p783_p13 = pneg %p1028_p11 }
  0x15   : > { %p784_p0 = pnand %p783_p13, %p782_p12 }
  0x17   : > { %p785_p3 = pneg %p784_p0 }
  0x19   : > { %p790_p7 = pnand %p788_p5, %p785_p3 }
  0x1b   : > { %793 = shalt.err (!%p790_p7)
}
  0x1c   : > { %s794_s14 = scalar_lea.vmem %s1021_s28, 1024  ;;  %p802_p2 = scmp.lt.s32.totalorder %s1021_s28, %s1021_s28 }
  0x1d   : > { %p795_p9 = scmp.ne.s32.totalorder %s1021_s28, %s794_s14  ;;  %p803_p12 = scmp.lt.s32.totalorder %s794_s14, %s794_s14 }
  0x1f   : > { %p797_p10 = pnand %p795_p9, %p783_p13  ;;  %p804_p0 = por %p803_p12, %p802_p2 }
  0x21   : > { %p798_p1 = pneg %p797_p10 }
  0x23   : > { %p805_p6 = pnand %p804_p0, %p798_p1 }
  0x25   : > { %808 = shalt.err (!%p805_p6)
}
  0x26   : > { %s941_s15 = smov 64   ;;  %s942_s16 = smov 4  }
  0x27   : > { %709 = dma.hbm_to_vmem [thread:$0]  (!%p1028_p11), %s1220_s1, 1024, %s1021_s28, [#allocation6], %s941_s15, %s941_s15, %s942_s16  }
  0x28   : > { %s809_s7 = scalar_lea.hbm %s1222_s3, 1024 }
  0x29   : > { %p810_p2 = scmp.ne.s32.totalorder %s1222_s3, %s809_s7  ;;  %p816_p10 = scmp.lt.u32.totalorder %s809_s7, %s1222_s3 }
  0x2b   : > { %p812_p1 = pnand %p810_p2, %p783_p13 }
  0x2d   : > { %p813_p6 = pneg %p812_p1 }
  0x2f   : > { %p818_p3 = pnand %p816_p10, %p813_p6 }
  0x31   : > { %821 = shalt.err (!%p818_p3)
}
  0x32   : > { %s822_s28 = scalar_lea.vmem %s1032_s6, 1024  ;;  %p830_p12 = scmp.lt.s32.totalorder %s1032_s6, %s1032_s6 }
  0x33   : > { %p823_p5 = scmp.ne.s32.totalorder %s1032_s6, %s822_s28  ;;  %p831_p0 = scmp.lt.s32.totalorder %s822_s28, %s822_s28 }
  0x35   : > { %p825_p7 = pnand %p823_p5, %p783_p13  ;;  %p832_p2 = por %p831_p0, %p830_p12 }
  0x37   : > { %p826_p9 = pneg %p825_p7 }
  0x39   : > { %p833_p1 = pnand %p832_p2, %p826_p9 }
  0x3b   : > { %836 = shalt.err (!%p833_p1)
}
  0x3c   : > { %712 = dma.hbm_to_vmem [thread:$0]  (!%p1028_p11), %s1222_s3, 1024, %s1032_s6, [#allocation6], %s941_s15, %s941_s15, %s942_s16  }
  0x3d   : > { %s1087_s14 = sadd.s32 1, %s937_s21   ;;  %s29_s29 = sadd.s32 1, %s933_s20 }
  0x3e   : > { %s26_s17 = ssub.s32 %s937_s21, %s1087_s14  ;;  %p36_p13 = scmp.ne.s32.totalorder %s933_s20, %s929_s19 }
  0x3f   : > { %p27_p6 = scmp.eq.s32.totalorder %s26_s17, 0  ;;  %p37_p10 = scmp.eq.s32.totalorder %s937_s21, 0 }
  0x40   : > { %p1232_p3 = scmp.eq.s32.totalorder %s998_s22, 1  ;;  %p723_p7 = scmp.lt.s32.totalorder %s937_s21, 2 }
  0x41   : > { %s1103_s27 = scalar_select %p27_p6, %s933_s20, %s29_s29  }
  0x42   : > { %p1097_p5 = por %p1232_p3, %p36_p13  ;;  %p38_p9 = por %p37_p10, %p36_p13 }
  0x43   : > { %s208_s30 = sand.u32 1, %s933_s20   ;;  %s608_s6 = sshll.u32 %s937_s21, 6 }
  0x44   : > { %s1233_s23 = scalar_select %p1097_p5, 1, 0 }
  0x45   : > { %s607_s7 = sshll.u32 %s208_s30, 2  ;;  %s1110_s8 = scalar_lea.hbm %s1219_s0, %s608_s6 }
  0x46   : > { %s212_s9 = scalar_lea.vmem [#allocation2], %s607_s7  ;;  %p1114_p11 = pnand %p723_p7, %p38_p9 }
  0x47   : > { %s219_s10 = sshll.u32 %s212_s9, 4  ;;  %s209_s28 = scalar_lea.sflag [#allocation3], %s208_s30  ;;  %s1112_s10 = int_to_ptr.vmem [resolvable:$true] %s219_s10 }
  0x48   : > { %s837_s12 = scalar_lea.hbm %s1110_s8, 64  ;;  %p839_p0 = pneg %p1114_p11 }
  0x49   : > { %p838_p12 = scmp.ne.s32.totalorder %s1110_s8, %s837_s12  ;;  %s842_s17 = scalar_lea.hbm %s1219_s0, 128 }
  0x4a   : > { %p843_p13 = scmp.lt.u32.totalorder %s1110_s8, %s1219_s0  ;;  %p844_p6 = scmp.lt.u32.totalorder %s842_s17, %s837_s12 }
  0x4b   : > { %p840_p2 = pnand %p839_p0, %p838_p12  ;;  %p846_p3 = scmp.lt.u32.totalorder %s837_s12, %s1110_s8 }
  0x4c   : > { %p845_p10 = por %p844_p6, %p843_p13 }
  0x4d   : > { %p841_p1 = pneg %p840_p2 }
  0x4e   : > { %p847_p7 = por %p846_p3, %p845_p10 }
  0x50   : > { %p848_p9 = pnand %p847_p7, %p841_p1 }
  0x52   : > { %851 = shalt.err (!%p848_p9)
}
  0x53   : > { %s852_s30 = scalar_lea.vmem %s1112_s10, 64  ;;  %s943_s15 = smov [#allocation2]  }
  0x54   : > { %p853_p12 = scmp.ne.s32.totalorder %s1112_s10, %s852_s30  ;;  %s857_s16 = sshll.u32 %s943_s15, 4  ;;  %s858_s16 = int_to_ptr.vmem [resolvable:$false] %s857_s16 }
  0x55   : > { %s859_s9 = scalar_lea.vmem %s858_s16, 128  ;;  %p860_p4 = scmp.lt.s32.totalorder %s1112_s10, %s858_s16 }
  0x56   : > { %p855_p2 = pnand %p853_p12, %p839_p0  ;;  %p861_p13 = scmp.lt.s32.totalorder %s859_s9, %s852_s30 }
  0x58   : > { %p856_p5 = pneg %p855_p2  ;;  %p862_p6 = por %p861_p13, %p860_p4 }
  0x5a   : > { %p863_p10 = pnand %p862_p6, %p856_p5 }
  0x5c   : > { %866 = shalt.err (!%p863_p10)
}
  0x5d   : > { %716 = dma.hbm_to_vmem [thread:$0]  (!%p1114_p11), %s1110_s8, 64, %s1112_s10, %s209_s28  }
  0x5e   : > { %228 = sbr.rel (%p1017_p8) target bundleno = 589 (0x24d), region = 40  ;;  %s1146_s12 = sand.u32 (!%p1017_p8), 1, %s929_s19  }
  0x5f   : > { %s610_s13 = sshll.u32 (!%p1017_p8), %s1146_s12, 2  ;;  %s231_s29 = scalar_lea.sflag (!%p1017_p8), [#allocation3], %s1146_s12 }
  0x60   : > { %s1152_s17 = scalar_lea.vmem (!%p1017_p8), [#allocation2], %s610_s13  ;;  %p1235_p4 = scmp.ne.s32.totalorder (!%p1017_p8), %s1228_s24, 0 }
  0x65   : > { %912 = dma.done.wait (%p1235_p4), %s231_s29, 64  }
  0x66   : > { %914 = vsyncadd (%p1235_p4), %s231_s29, 4294967232  ;;  %p1236_p5 = scmp.eq.s32.totalorder %s998_s22, 0 }
  0x68   : > { %916 = dma.done.wait (%p1236_p5), [#allocation6], 2048   ;;  %p1237_p8 = pmov %p1236_p5 }
  0x69   : > { %v944_v0 = vmov 0.0   ;;  %vm945_vm0 = vmmov 0   ;;  %v765_v1 = vld [vmem:[#allocation5] sm:$0xff]   ;;  %v766_v2 = vld [vmem:[#allocation5 + $0x8] sm:$0xff]   ;;  %v767_v3 = vld [vmem:[#allocation5 + $0x10] sm:$0xff]   ;;  %s633_s11 = sshll.u32 %s998_s22, 6 }
  0x6a   : > { %918 = vsyncadd (%p1237_p8), [#allocation6], 4294965248  ;;  %654 = vmatprep.subr.bf16.mxu0 %v944_v0  ;;  %670 = vmatprep.mubr.msk.bf16.mxu0 %vm945_vm0, %v944_v0  ;;  %v773_v4 = vld [vmem:[#allocation7] sm:$0xff]   ;;  %v768_v5 = vld [vmem:[#allocation5 + $0x18] sm:$0xff]   ;;  %s268_s28 = scalar_lea.vmem [#allocation8], %s610_s13  ;;  %s1175_s15 = scalar_lea.hbm %s1224_s5, %s633_s11 }
  0x6b   : > { %674 = vmatprep.subr.bf16.mxu1 %v944_v0  ;;  %690 = vmatprep.mubr.msk.bf16.mxu1 %vm945_vm0, %v944_v0  ;;  %v774_v6 = vld [vmem:[#allocation7 + $0x8] sm:$0xff]   ;;  %v769_v7 = vld [vmem:[#allocation5 + $0x20] sm:$0xff]   ;;  %v775_v8 = vld [vmem:[#allocation7 + $0x10] sm:$0xff]   ;;  %s513_s7 = sshll.u32 %s268_s28, 4  ;;  %s500_s16 = scalar_lea.sflag [#allocation4], %s1146_s12  ;;  %s1177_s7 = int_to_ptr.vmem [resolvable:$true] %s513_s7 }
  0x6c   : > { %655 = vmatpush3.bf16.msra.mxu0 %v765_v1  ;;  %675 = vmatpush3.bf16.msra.mxu1 %v773_v4  ;;  %v770_v9 = vld [vmem:[#allocation5 + $0x28] sm:$0xff]   ;;  %v776_v10 = vld [vmem:[#allocation7 + $0x18] sm:$0xff]   ;;  %v771_v11 = vld [vmem:[#allocation5 + $0x30] sm:$0xff]   ;;  %s867_s9 = scalar_lea.vmem %s1177_s7, 64  ;;  %p1238_p0 = scmp.ne.s32.totalorder %s1233_s23, 0 }
  0x6d   : > { %656 = vmatprep.subr.bf16.mxu0 %v944_v0  ;;  %676 = vmatprep.subr.bf16.mxu1 %v944_v0  ;;  %v777_v12 = vld [vmem:[#allocation7 + $0x20] sm:$0xff]   ;;  %v772_v13 = vld [vmem:[#allocation5 + $0x38] sm:$0xff]   ;;  %v778_v14 = vld [vmem:[#allocation7 + $0x28] sm:$0xff]   ;;  %p868_p11 = scmp.ne.s32.totalorder %s1177_s7, %s867_s9  ;;  %s946_s22 = smov [#allocation8]  }
  0x6e   : > { %v270_v15 = vld [vmem:[%s1152_s17] sm:$0xf]  ;;  %v779_v16 = vld [vmem:[#allocation7 + $0x30] sm:$0xff]   ;;  %s871_s13 = sshll.u32 %s946_s22, 4  ;;  %s872_s13 = int_to_ptr.vmem [resolvable:$false] %s871_s13 }
  0x6f   : > { %v780_v17 = vld [vmem:[#allocation7 + $0x38] sm:$0xff]   ;;  %v495_v27 = vunpack.c.l.bf16 %v270_v15  ;;  %p869_p1 = pnand %p868_p11, %p1238_p0  ;;  %s873_s29 = scalar_lea.vmem %s872_s13, 128 }
  0x70   : > { %657 = vmatpush3.bf16.msra.mxu0 %v766_v2  ;;  %677 = vmatpush3.bf16.msra.mxu1 %v774_v6  ;;  %v614_v18 = vld [vmem:[%s1221_s2] ss:$0 sm:$0xff]  ;;  %p874_p7 = scmp.lt.s32.totalorder %s1177_s7, %s872_s13  ;;  %p875_p9 = scmp.lt.s32.totalorder %s873_s29, %s867_s9 }
  0x71   : > { %658 = vmatprep.subr.bf16.mxu0 %v944_v0  ;;  %678 = vmatprep.subr.bf16.mxu1 %v944_v0  ;;  %v623_v26 = vld [vmem:[%s1223_s4] ss:$0 sm:$0xff]  ;;  %p870_p3 = pneg %p869_p1 }
  0x72   : > { %p876_p12 = por %p875_p9, %p874_p7 }
  0x74   : > { %659 = vmatpush3.bf16.msra.mxu0 %v767_v3  ;;  %679 = vmatpush3.bf16.msra.mxu1 %v775_v8  ;;  %p877_p2 = pnand %p876_p12, %p870_p3 }
  0x75   : > { %660 = vmatprep.subr.bf16.mxu0 %v944_v0  ;;  %680 = vmatprep.subr.bf16.mxu1 %v944_v0 }
  0x78   : > { %661 = vmatpush3.bf16.msra.mxu0 %v768_v5  ;;  %681 = vmatpush3.bf16.msra.mxu1 %v776_v10 }
  0x79   : > { %662 = vmatprep.subr.bf16.mxu0 %v944_v0  ;;  %682 = vmatprep.subr.bf16.mxu1 %v944_v0 }
  0x7c   : > { %663 = vmatpush3.bf16.msra.mxu0 %v769_v7  ;;  %683 = vmatpush3.bf16.msra.mxu1 %v777_v12 }
  0x7d   : > { %664 = vmatprep.subr.bf16.mxu0 %v944_v0  ;;  %684 = vmatprep.subr.bf16.mxu1 %v944_v0 }
  0x80   : > { %665 = vmatpush3.bf16.msra.mxu0 %v770_v9  ;;  %685 = vmatpush3.bf16.msra.mxu1 %v778_v14 }
  0x81   : > { %666 = vmatprep.subr.bf16.mxu0 %v944_v0  ;;  %686 = vmatprep.subr.bf16.mxu1 %v944_v0 }
  0x84   : > { %667 = vmatpush3.bf16.msra.mxu0 %v771_v11  ;;  %687 = vmatpush3.bf16.msra.mxu1 %v779_v16 }
  0x85   : > { %668 = vmatprep.subr.bf16.mxu0 %v944_v0  ;;  %688 = vmatprep.subr.bf16.mxu1 %v944_v0 }
  0x88   : > { %669 = vmatpush3.bf16.msra.mxu0 %v772_v13  ;;  %689 = vmatpush3.bf16.msra.mxu1 %v780_v17 }
  0x8b   : > { %671 = vmatmul.mubr.bf16.vlgmr.msra.gmra.mrb[0].mxu0 %v270_v15 }
 0x15e   : > { %v376_v19 = vpop.f32.mrb[0].mxu0 }
 0x15f   : > { %v377_v20 = vadd.f32 %v614_v18, %v376_v19  ;;  %v672_v21 = vpop.f32.mrb[1].mxu0 }
 0x160   : > { %v379_v22 = vpop.f32.mrb[2].mxu0 }
 0x161   : > { %v382_v23 = vmax.f32 %v377_v20, 0.0  ;;  %v673_v24 = vpop.f32.mrb[3].mxu0 }
 0x163   : > { %v383_v25 = vpack.c.bf16 %v382_v23, %v382_v23 }
 0x165   : > { %691 = vmatmul.mubr.bf16.vlgmr.msra.gmra.mrb[0].mxu1 %v383_v25 }
 0x238   : > { %v489_v28 = vpop.f32.mrb[0].mxu1 }
 0x239   : > { %v490_v29 = vadd.f32 %v623_v26, %v489_v28  ;;  %v692_v30 = vpop.f32.mrb[1].mxu1 }
 0x23a   : > { %v492_v31 = vpop.f32.mrb[2].mxu1 }
 0x23b   : > { %v496_v32 = vadd.f32 %v495_v27, %v490_v29  ;;  %v693_v33 = vpop.f32.mrb[3].mxu1 }
 0x23d   : > { %v497_v34 = vpack.c.bf16 %v496_v32, %v496_v32 }
 0x23f   : > { %498 = vst [vmem:[%s268_s28] sm:$0xf] %v497_v34 }
 0x240   : > { %880 = shalt.err (!%p877_p2)
}
 0x241   : > { %s881_s12 = scalar_lea.hbm %s1175_s15, 64  ;;  %s885_s26 = scalar_lea.hbm %s1224_s5, 128 }
 0x242   : > { %p882_p13 = scmp.ne.s32.totalorder %s1175_s15, %s881_s12  ;;  %p886_p4 = scmp.lt.u32.totalorder %s1175_s15, %s1224_s5 }
 0x243   : > { %p887_p5 = scmp.lt.u32.totalorder %s885_s26, %s881_s12  ;;  %p889_p11 = scmp.lt.u32.totalorder %s881_s12, %s1175_s15 }
 0x244   : > { %p883_p6 = pnand %p882_p13, %p1238_p0 }
 0x245   : > { %p888_p8 = por %p887_p5, %p886_p4 }
 0x246   : > { %p884_p10 = pneg %p883_p6 }
 0x247   : > { %p890_p1 = por %p889_p11, %p888_p8 }
 0x249   : > { %p891_p3 = pnand %p890_p1, %p884_p10 }
 0x24b   : > { %894 = shalt.err (!%p891_p3)
}
 0x24c   : > { %704 = dma.vmem_to_hbm [thread:$0]  (%p1238_p0), %s1177_s7, 64, %s1175_s15, %s500_s16  }
 0x24d PF: > { %s525_s11 = sand.u32 1, %s925_s18   ;;  %p1239_p7 = scmp.ne.s32.totalorder %s1229_s25, 0 }
 0x24e   : > { %p1240_p9 = scmp.ge.s32.totalorder %s937_s21, 2  ;;  %s526_s28 = scalar_lea.sflag [#allocation4], %s525_s11 }
 0x250   : > { %p718_p12 = pnand %p1240_p9, %p1239_p7 }
 0x252   : > { %920 = dma.done.wait (!%p718_p12), %s526_s28, 64  }
 0x253   : > { %922 = vsyncadd (!%p718_p12), %s526_s28, 4294967232  ;;  %p19_p2 = scmp.ge.s32.totalorder %s1087_s14, 4   ;;  %s1241_s18 = smov %s929_s19 }
 0x254   : > { %s1242_s19 = smov %s933_s20  ;;  %s1243_s20 = smov %s1103_s27 }
 0x255   : > { %s1244_s21 = smov %s1087_s14  ;;  %21 = sbr.rel (!%p19_p2) target bundleno = 6 (0x6), region = 93 }
 0x25c   :  { %531 = vsyncpa [#allocation3], 1 }
 0x25d   :  { %533 = vsyncpa [#allocation3 + $0x1], 1 }
 0x25e   :  { %534 = vsyncpa [#allocation6], 1 }
 0x25f   :  { %535 = vsyncpa [#allocation4], 1 }
 0x260   :  { %537 = vsyncpa [#allocation4 + $0x1], 1 }

// kernel: tpu_custom_call.1
= control target key start
LH: loop header
LB: loop body
LE: loop exit
PB: predicated region body
PF: predicated region fallthrough
CT: control target
= control target key end

     0   :  { %10 = vsyncpa [#allocation3], 0  ;;  %s1219_s0 = inlined_call_operand.hbm [shape: bf16[16,128], index: 0, kind: input, shape index: {}]   ;;  %s1220_s1 = inlined_call_operand.hbm [shape: bf16[128,128], index: 1, kind: input, shape index: {}]   ;;  %s1221_s2 = inlined_call_operand.vmem [shape: f32[1,128], index: 2, kind: input, shape index: {}]   ;;  %s1222_s3 = inlined_call_operand.hbm [shape: bf16[128,128], index: 3, kind: input, shape index: {}]   ;;  %s1223_s4 = inlined_call_operand.vmem [shape: f32[1,128], index: 4, kind: input, shape index: {}]   ;;  %s1224_s5 = inlined_call_operand.hbm [shape: bf16[16,128], index: 5, kind: output, shape index: {}]  }
   0x1   :  { %12 = vsyncpa [#allocation3 + $0x1], 0 }
   0x2   :  { %13 = vsyncpa [#allocation6], 0 }
   0x3   :  { %14 = vsyncpa [#allocation4], 0 }
   0x4   :  { %16 = vsyncpa [#allocation4 + $0x1], 0  ;;  %s977_s18 = smov 0   ;;  %s979_s19 = smov 0  }
   0x5   :  { %s981_s20 = smov 0   ;;  %s983_s21 = smov 0  }
   0x6 LB: > { %s998_s22 = sadd.s32 4294967295, %s937_s21   ;;  %s602_s23 = sadd.s32 4294967294, %s937_s21   ;;  %s937_s21 = sphi %s983_s21, %s1244_s21   ;;  %s933_s20 = sphi %s981_s20, %s1243_s20   ;;  %s929_s19 = sphi %s979_s19, %s1242_s19   ;;  %s925_s18 = sphi %s977_s18, %s1241_s18  }
   0x7   : > { %p42_p0 = scmp.ne.s32.totalorder %s929_s19, %s925_s18  ;;  %p1225_p1 = scmp.eq.s32.totalorder %s998_s22, 0 }
   0x8   : > { %p156_p3 = scmp.eq.s32.totalorder %s602_s23, 1  ;;  %p603_p5 = scmp.ge.s32.totalorder %s937_s21, 1 }
   0x9   : > { %p1007_p4 = por %p1225_p1, %p42_p0  ;;  %p163_p7 = scmp.lt.s32.totalorder %s937_s21, 3 }
   0xa   : > { %p1012_p6 = por %p156_p3, %p42_p0  ;;  %s939_s27 = smov [#allocation5]  }
   0xb   : > { %s1228_s24 = scalar_select %p1007_p4, 1, 0 }
   0xc   : > { %s1229_s25 = scalar_select %p1012_p6, 1, 0 }
   0xd   : > { %p1017_p8 = pnand %p603_p5, %p163_p7  ;;  %s175_s28 = sshll.u32 %s939_s27, 4  ;;  %s1021_s28 = int_to_ptr.vmem [resolvable:$true] %s175_s28 }
   0xe   : > { %s940_s30 = smov [#allocation7]   ;;  %s781_s9 = scalar_lea.hbm %s1220_s1, 1024 }
   0xf   : > { %p706_p9 = pneg %p1017_p8  ;;  %s191_s6 = sshll.u32 %s940_s30, 4  ;;  %s1032_s6 = int_to_ptr.vmem [resolvable:$true] %s191_s6 }
  0x10   : > { %p782_p12 = scmp.ne.s32.totalorder %s1220_s1, %s781_s9  ;;  %p788_p5 = scmp.lt.u32.totalorder %s781_s9, %s1220_s1 }
  0x11   : > { %p1028_p11 = pnand %p706_p9, %p1225_p1 }
  0x13   : > { %p783_p13 = pneg %p1028_p11 }
  0x15   : > { %p784_p0 = pnand %p783_p13, %p782_p12 }
  0x17   : > { %p785_p3 = pneg %p784_p0 }
  0x19   : > { %p790_p7 = pnand %p788_p5, %p785_p3 }
  0x1b   : > { %793 = shalt.err (!%p790_p7)
}
  0x1c   : > { %s794_s14 = scalar_lea.vmem %s1021_s28, 1024  ;;  %p802_p2 = scmp.lt.s32.totalorder %s1021_s28, %s1021_s28 }
  0x1d   : > { %p795_p9 = scmp.ne.s32.totalorder %s1021_s28, %s794_s14  ;;  %p803_p12 = scmp.lt.s32.totalorder %s794_s14, %s794_s14 }
  0x1f   : > { %p797_p10 = pnand %p795_p9, %p783_p13  ;;  %p804_p0 = por %p803_p12, %p802_p2 }
  0x21   : > { %p798_p1 = pneg %p797_p10 }
  0x23   : > { %p805_p6 = pnand %p804_p0, %p798_p1 }
  0x25   : > { %808 = shalt.err (!%p805_p6)
}
  0x26   : > { %s941_s15 = smov 64   ;;  %s942_s16 = smov 4  }
  0x27   : > { %709 = dma.hbm_to_vmem [thread:$0]  (!%p1028_p11), %s1220_s1, 1024, %s1021_s28, [#allocation6], %s941_s15, %s941_s15, %s942_s16  }
  0x28   : > { %s809_s7 = scalar_lea.hbm %s1222_s3, 1024 }
  0x29   : > { %p810_p2 = scmp.ne.s32.totalorder %s1222_s3, %s809_s7  ;;  %p816_p10 = scmp.lt.u32.totalorder %s809_s7, %s1222_s3 }
  0x2b   : > { %p812_p1 = pnand %p810_p2, %p783_p13 }
  0x2d   : > { %p813_p6 = pneg %p812_p1 }
  0x2f   : > { %p818_p3 = pnand %p816_p10, %p813_p6 }
  0x31   : > { %821 = shalt.err (!%p818_p3)
}
  0x32   : > { %s822_s28 = scalar_lea.vmem %s1032_s6, 1024  ;;  %p830_p12 = scmp.lt.s32.totalorder %s1032_s6, %s1032_s6 }
  0x33   : > { %p823_p5 = scmp.ne.s32.totalorder %s1032_s6, %s822_s28  ;;  %p831_p0 = scmp.lt.s32.totalorder %s822_s28, %s822_s28 }
  0x35   : > { %p825_p7 = pnand %p823_p5, %p783_p13  ;;  %p832_p2 = por %p831_p0, %p830_p12 }
  0x37   : > { %p826_p9 = pneg %p825_p7 }
  0x39   : > { %p833_p1 = pnand %p832_p2, %p826_p9 }
  0x3b   : > { %836 = shalt.err (!%p833_p1)
}
  0x3c   : > { %712 = dma.hbm_to_vmem [thread:$0]  (!%p1028_p11), %s1222_s3, 1024, %s1032_s6, [#allocation6], %s941_s15, %s941_s15, %s942_s16  }
  0x3d   : > { %s1087_s14 = sadd.s32 1, %s937_s21   ;;  %s29_s29 = sadd.s32 1, %s933_s20 }
  0x3e   : > { %s26_s17 = ssub.s32 %s937_s21, %s1087_s14  ;;  %p36_p13 = scmp.ne.s32.totalorder %s933_s20, %s929_s19 }
  0x3f   : > { %p27_p6 = scmp.eq.s32.totalorder %s26_s17, 0  ;;  %p37_p10 = scmp.eq.s32.totalorder %s937_s21, 0 }
  0x40   : > { %p1232_p3 = scmp.eq.s32.totalorder %s998_s22, 1  ;;  %p723_p7 = scmp.lt.s32.totalorder %s937_s21, 2 }
  0x41   : > { %s1103_s27 = scalar_select %p27_p6, %s933_s20, %s29_s29  }
  0x42   : > { %p1097_p5 = por %p1232_p3, %p36_p13  ;;  %p38_p9 = por %p37_p10, %p36_p13 }
  0x43   : > { %s208_s30 = sand.u32 1, %s933_s20   ;;  %s608_s6 = sshll.u32 %s937_s21, 6 }
  0x44   : > { %s1233_s23 = scalar_select %p1097_p5, 1, 0 }
  0x45   : > { %s607_s7 = sshll.u32 %s208_s30, 2  ;;  %s1110_s8 = scalar_lea.hbm %s1219_s0, %s608_s6 }
  0x46   : > { %s212_s9 = scalar_lea.vmem [#allocation2], %s607_s7  ;;  %p1114_p11 = pnand %p723_p7, %p38_p9 }
  0x47   : > { %s219_s10 = sshll.u32 %s212_s9, 4  ;;  %s209_s28 = scalar_lea.sflag [#allocation3], %s208_s30  ;;  %s1112_s10 = int_to_ptr.vmem [resolvable:$true] %s219_s10 }
  0x48   : > { %s837_s12 = scalar_lea.hbm %s1110_s8, 64  ;;  %p839_p0 = pneg %p1114_p11 }
  0x49   : > { %p838_p12 = scmp.ne.s32.totalorder %s1110_s8, %s837_s12  ;;  %s842_s17 = scalar_lea.hbm %s1219_s0, 128 }
  0x4a   : > { %p843_p13 = scmp.lt.u32.totalorder %s1110_s8, %s1219_s0  ;;  %p844_p6 = scmp.lt.u32.totalorder %s842_s17, %s837_s12 }
  0x4b   : > { %p840_p2 = pnand %p839_p0, %p838_p12  ;;  %p846_p3 = scmp.lt.u32.totalorder %s837_s12, %s1110_s8 }
  0x4c   : > { %p845_p10 = por %p844_p6, %p843_p13 }
  0x4d   : > { %p841_p1 = pneg %p840_p2 }
  0x4e   : > { %p847_p7 = por %p846_p3, %p845_p10 }
  0x50   : > { %p848_p9 = pnand %p847_p7, %p841_p1 }
  0x52   : > { %851 = shalt.err (!%p848_p9)
}
  0x53   : > { %s852_s30 = scalar_lea.vmem %s1112_s10, 64  ;;  %s943_s15 = smov [#allocation2]  }
  0x54   : > { %p853_p12 = scmp.ne.s32.totalorder %s1112_s10, %s852_s30  ;;  %s857_s16 = sshll.u32 %s943_s15, 4  ;;  %s858_s16 = int_to_ptr.vmem [resolvable:$false] %s857_s16 }
  0x55   : > { %s859_s9 = scalar_lea.vmem %s858_s16, 128  ;;  %p860_p4 = scmp.lt.s32.totalorder %s1112_s10, %s858_s16 }
  0x56   : > { %p855_p2 = pnand %p853_p12, %p839_p0  ;;  %p861_p13 = scmp.lt.s32.totalorder %s859_s9, %s852_s30 }
  0x58   : > { %p856_p5 = pneg %p855_p2  ;;  %p862_p6 = por %p861_p13, %p860_p4 }
  0x5a   : > { %p863_p10 = pnand %p862_p6, %p856_p5 }
  0x5c   : > { %866 = shalt.err (!%p863_p10)
}
  0x5d   : > { %716 = dma.hbm_to_vmem [thread:$0]  (!%p1114_p11), %s1110_s8, 64, %s1112_s10, %s209_s28  }
  0x5e   : > { %228 = sbr.rel (%p1017_p8) target bundleno = 589 (0x24d), region = 40  ;;  %s1146_s12 = sand.u32 (!%p1017_p8), 1, %s929_s19  }
  0x5f   : > { %s610_s13 = sshll.u32 (!%p1017_p8), %s1146_s12, 2  ;;  %s231_s29 = scalar_lea.sflag (!%p1017_p8), [#allocation3], %s1146_s12 }
  0x60   : > { %s1152_s17 = scalar_lea.vmem (!%p1017_p8), [#allocation2], %s610_s13  ;;  %p1235_p4 = scmp.ne.s32.totalorder (!%p1017_p8), %s1228_s24, 0 }
  0x65   : > { %912 = dma.done.wait (%p1235_p4), %s231_s29, 64  }
  0x66   : > { %914 = vsyncadd (%p1235_p4), %s231_s29, 4294967232  ;;  %p1236_p5 = scmp.eq.s32.totalorder %s998_s22, 0 }
  0x68   : > { %916 = dma.done.wait (%p1236_p5), [#allocation6], 2048   ;;  %p1237_p8 = pmov %p1236_p5 }
  0x69   : > { %v944_v0 = vmov 0.0   ;;  %vm945_vm0 = vmmov 0   ;;  %v765_v1 = vld [vmem:[#allocation5] sm:$0xff]   ;;  %v766_v2 = vld [vmem:[#allocation5 + $0x8] sm:$0xff]   ;;  %v767_v3 = vld [vmem:[#allocation5 + $0x10] sm:$0xff]   ;;  %s633_s11 = sshll.u32 %s998_s22, 6 }
  0x6a   : > { %918 = vsyncadd (%p1237_p8), [#allocation6], 4294965248  ;;  %654 = vmatprep.subr.bf16.mxu0 %v944_v0  ;;  %670 = vmatprep.mubr.msk.bf16.mxu0 %vm945_vm0, %v944_v0  ;;  %v773_v4 = vld [vmem:[#allocation7] sm:$0xff]   ;;  %v768_v5 = vld [vmem:[#allocation5 + $0x18] sm:$0xff]   ;;  %s268_s28 = scalar_lea.vmem [#allocation8], %s610_s13  ;;  %s1175_s15 = scalar_lea.hbm %s1224_s5, %s633_s11 }
  0x6b   : > { %674 = vmatprep.subr.bf16.mxu1 %v944_v0  ;;  %690 = vmatprep.mubr.msk.bf16.mxu1 %vm945_vm0, %v944_v0  ;;  %v774_v6 = vld [vmem:[#allocation7 + $0x8] sm:$0xff]   ;;  %v769_v7 = vld [vmem:[#allocation5 + $0x20] sm:$0xff]   ;;  %v775_v8 = vld [vmem:[#allocation7 + $0x10] sm:$0xff]   ;;  %s513_s7 = sshll.u32 %s268_s28, 4  ;;  %s500_s16 = scalar_lea.sflag [#allocation4], %s1146_s12  ;;  %s1177_s7 = int_to_ptr.vmem [resolvable:$true] %s513_s7 }
  0x6c   : > { %655 = vmatpush3.bf16.msra.mxu0 %v765_v1  ;;  %675 = vmatpush3.bf16.msra.mxu1 %v773_v4  ;;  %v770_v9 = vld [vmem:[#allocation5 + $0x28] sm:$0xff]   ;;  %v776_v10 = vld [vmem:[#allocation7 + $0x18] sm:$0xff]   ;;  %v771_v11 = vld [vmem:[#allocation5 + $0x30] sm:$0xff]   ;;  %s867_s9 = scalar_lea.vmem %s1177_s7, 64  ;;  %p1238_p0 = scmp.ne.s32.totalorder %s1233_s23, 0 }
  0x6d   : > { %656 = vmatprep.subr.bf16.mxu0 %v944_v0  ;;  %676 = vmatprep.subr.bf16.mxu1 %v944_v0  ;;  %v777_v12 = vld [vmem:[#allocation7 + $0x20] sm:$0xff]   ;;  %v772_v13 = vld [vmem:[#allocation5 + $0x38] sm:$0xff]   ;;  %v778_v14 = vld [vmem:[#allocation7 + $0x28] sm:$0xff]   ;;  %p868_p11 = scmp.ne.s32.totalorder %s1177_s7, %s867_s9  ;;  %s946_s22 = smov [#allocation8]  }
  0x6e   : > { %v270_v15 = vld [vmem:[%s1152_s17] sm:$0xf]  ;;  %v779_v16 = vld [vmem:[#allocation7 + $0x30] sm:$0xff]   ;;  %s871_s13 = sshll.u32 %s946_s22, 4  ;;  %s872_s13 = int_to_ptr.vmem [resolvable:$false] %s871_s13 }
  0x6f   : > { %v780_v17 = vld [vmem:[#allocation7 + $0x38] sm:$0xff]   ;;  %v495_v27 = vunpack.c.l.bf16 %v270_v15  ;;  %p869_p1 = pnand %p868_p11, %p1238_p0  ;;  %s873_s29 = scalar_lea.vmem %s872_s13, 128 }
  0x70   : > { %657 = vmatpush3.bf16.msra.mxu0 %v766_v2  ;;  %677 = vmatpush3.bf16.msra.mxu1 %v774_v6  ;;  %v614_v18 = vld [vmem:[%s1221_s2] ss:$0 sm:$0xff]  ;;  %p874_p7 = scmp.lt.s32.totalorder %s1177_s7, %s872_s13  ;;  %p875_p9 = scmp.lt.s32.totalorder %s873_s29, %s867_s9 }
  0x71   : > { %658 = vmatprep.subr.bf16.mxu0 %v944_v0  ;;  %678 = vmatprep.subr.bf16.mxu1 %v944_v0  ;;  %v623_v26 = vld [vmem:[%s1223_s4] ss:$0 sm:$0xff]  ;;  %p870_p3 = pneg %p869_p1 }
  0x72   : > { %p876_p12 = por %p875_p9, %p874_p7 }
  0x74   : > { %659 = vmatpush3.bf16.msra.mxu0 %v767_v3  ;;  %679 = vmatpush3.bf16.msra.mxu1 %v775_v8  ;;  %p877_p2 = pnand %p876_p12, %p870_p3 }
  0x75   : > { %660 = vmatprep.subr.bf16.mxu0 %v944_v0  ;;  %680 = vmatprep.subr.bf16.mxu1 %v944_v0 }
  0x78   : > { %661 = vmatpush3.bf16.msra.mxu0 %v768_v5  ;;  %681 = vmatpush3.bf16.msra.mxu1 %v776_v10 }
  0x79   : > { %662 = vmatprep.subr.bf16.mxu0 %v944_v0  ;;  %682 = vmatprep.subr.bf16.mxu1 %v944_v0 }
  0x7c   : > { %663 = vmatpush3.bf16.msra.mxu0 %v769_v7  ;;  %683 = vmatpush3.bf16.msra.mxu1 %v777_v12 }
  0x7d   : > { %664 = vmatprep.subr.bf16.mxu0 %v944_v0  ;;  %684 = vmatprep.subr.bf16.mxu1 %v944_v0 }
  0x80   : > { %665 = vmatpush3.bf16.msra.mxu0 %v770_v9  ;;  %685 = vmatpush3.bf16.msra.mxu1 %v778_v14 }
  0x81   : > { %666 = vmatprep.subr.bf16.mxu0 %v944_v0  ;;  %686 = vmatprep.subr.bf16.mxu1 %v944_v0 }
  0x84   : > { %667 = vmatpush3.bf16.msra.mxu0 %v771_v11  ;;  %687 = vmatpush3.bf16.msra.mxu1 %v779_v16 }
  0x85   : > { %668 = vmatprep.subr.bf16.mxu0 %v944_v0  ;;  %688 = vmatprep.subr.bf16.mxu1 %v944_v0 }
  0x88   : > { %669 = vmatpush3.bf16.msra.mxu0 %v772_v13  ;;  %689 = vmatpush3.bf16.msra.mxu1 %v780_v17 }
  0x8b   : > { %671 = vmatmul.mubr.bf16.vlgmr.msra.gmra.mrb[0].mxu0 %v270_v15 }
 0x15e   : > { %v376_v19 = vpop.f32.mrb[0].mxu0 }
 0x15f   : > { %v377_v20 = vadd.f32 %v614_v18, %v376_v19  ;;  %v672_v21 = vpop.f32.mrb[1].mxu0 }
 0x160   : > { %v379_v22 = vpop.f32.mrb[2].mxu0 }
 0x161   : > { %v382_v23 = vmax.f32 %v377_v20, 0.0  ;;  %v673_v24 = vpop.f32.mrb[3].mxu0 }
 0x163   : > { %v383_v25 = vpack.c.bf16 %v382_v23, %v382_v23 }
 0x165   : > { %691 = vmatmul.mubr.bf16.vlgmr.msra.gmra.mrb[0].mxu1 %v383_v25 }
 0x238   : > { %v489_v28 = vpop.f32.mrb[0].mxu1 }
 0x239   : > { %v490_v29 = vadd.f32 %v623_v26, %v489_v28  ;;  %v692_v30 = vpop.f32.mrb[1].mxu1 }
 0x23a   : > { %v492_v31 = vpop.f32.mrb[2].mxu1 }
 0x23b   : > { %v496_v32 = vadd.f32 %v495_v27, %v490_v29  ;;  %v693_v33 = vpop.f32.mrb[3].mxu1 }
 0x23d   : > { %v497_v34 = vpack.c.bf16 %v496_v32, %v496_v32 }
 0x23f   : > { %498 = vst [vmem:[%s268_s28] sm:$0xf] %v497_v34 }
 0x240   : > { %880 = shalt.err (!%p877_p2)
}
 0x241   : > { %s881_s12 = scalar_lea.hbm %s1175_s15, 64  ;;  %s885_s26 = scalar_lea.hbm %s1224_s5, 128 }
 0x242   : > { %p882_p13 = scmp.ne.s32.totalorder %s1175_s15, %s881_s12  ;;  %p886_p4 = scmp.lt.u32.totalorder %s1175_s15, %s1224_s5 }
 0x243   : > { %p887_p5 = scmp.lt.u32.totalorder %s885_s26, %s881_s12  ;;  %p889_p11 = scmp.lt.u32.totalorder %s881_s12, %s1175_s15 }
 0x244   : > { %p883_p6 = pnand %p882_p13, %p1238_p0 }
 0x245   : > { %p888_p8 = por %p887_p5, %p886_p4 }
 0x246   : > { %p884_p10 = pneg %p883_p6 }
 0x247   : > { %p890_p1 = por %p889_p11, %p888_p8 }
 0x249   : > { %p891_p3 = pnand %p890_p1, %p884_p10 }
 0x24b   : > { %894 = shalt.err (!%p891_p3)
}
 0x24c   : > { %704 = dma.vmem_to_hbm [thread:$0]  (%p1238_p0), %s1177_s7, 64, %s1175_s15, %s500_s16  }
 0x24d PF: > { %s525_s11 = sand.u32 1, %s925_s18   ;;  %p1239_p7 = scmp.ne.s32.totalorder %s1229_s25, 0 }
 0x24e   : > { %p1240_p9 = scmp.ge.s32.totalorder %s937_s21, 2  ;;  %s526_s28 = scalar_lea.sflag [#allocation4], %s525_s11 }
 0x250   : > { %p718_p12 = pnand %p1240_p9, %p1239_p7 }
 0x252   : > { %920 = dma.done.wait (!%p718_p12), %s526_s28, 64  }
 0x253   : > { %922 = vsyncadd (!%p718_p12), %s526_s28, 4294967232  ;;  %p19_p2 = scmp.ge.s32.totalorder %s1087_s14, 4   ;;  %s1241_s18 = smov %s929_s19 }
 0x254   : > { %s1242_s19 = smov %s933_s20  ;;  %s1243_s20 = smov %s1103_s27 }
 0x255   : > { %s1244_s21 = smov %s1087_s14  ;;  %21 = sbr.rel (!%p19_p2) target bundleno = 6 (0x6), region = 93 }
 0x25c   :  { %531 = vsyncpa [#allocation3], 1 }
 0x25d   :  { %533 = vsyncpa [#allocation3 + $0x1], 1 }
 0x25e   :  { %534 = vsyncpa [#allocation6], 1 }
 0x25f   :  { %535 = vsyncpa [#allocation4], 1 }
 0x260   :  { %537 = vsyncpa [#allocation4 + $0x1], 1 }

</bundles_post_ra>
